<compile_context>
chip_gen: v7x
topology: tpu7x:2x2x1
jax: 0.10.0
libtpu: 0.0.40
codegen_flags: <defaults>
</compile_context>

<pallas_src>
import functools
import math

import jax
import jax.numpy as jnp
from jax.experimental import pallas as pl
from jax.experimental.pallas import tpu as pltpu


# ---------------------------------------------------------------------------
# Fused kernel: all layers in one body; running activation stays on-chip.
# ---------------------------------------------------------------------------
def _fused_mlp_kernel(x_ref, b_ref, *refs, layer_dims, bias_offsets):
    """refs = (w_0, ..., w_{L-1}, o_ref).

    x_ref : (TM, K0p)        bf16 activations tile
    b_ref : (1, sum(Np_i))   f32 packed bias row (zero-padded)
    w_i   : (Kip, Nip)       bf16 weight (pre-transposed, zero-padded)
    o_ref : (TM, NLp)        f32 output tile
    """
    o_ref = refs[-1]
    w_refs = refs[:-1]
    num_layers = len(w_refs)

    h = x_ref[...]  # already bf16 -> native MXU path; accumulate in f32.
    for i in range(num_layers):
        np_ = layer_dims[i]
        off = bias_offsets[i]
        y = jnp.dot(h, w_refs[i][...], preferred_element_type=jnp.float32)
        y = y + b_ref[:, off:off + np_]    # broadcast (1, N) over rows, f32
        y = jnp.maximum(y, 0.0)            # ReLU (every layer, incl. last)
        if i + 1 < num_layers:
            h = y.astype(jnp.bfloat16)     # stays on-chip; feeds next matmul
        else:
            h = y
    o_ref[...] = h.astype(o_ref.dtype)


# ---------------------------------------------------------------------------
# Parameter init (matches PyTorch nn.Linear shapes + DNN's weight re-init)
# ---------------------------------------------------------------------------
def init_dnn_params(key, inputs_dim, hidden_units, init_std=1e-4):
    """weight_i: (out, in) ~ Normal(0, init_std); bias: default U(+-1/sqrt(fan_in))."""
    dims = [inputs_dim] + list(hidden_units)
    params = []
    for i in range(len(dims) - 1):
        key, kw, kb = jax.random.split(key, 3)
        fan_in, fan_out = dims[i], dims[i + 1]
        w = init_std * jax.random.normal(kw, (fan_out, fan_in), jnp.float32)
        bound = 1.0 / math.sqrt(fan_in)
        b = jax.random.uniform(kb, (fan_out,), jnp.float32, -bound, bound)
        params.append((w, b))
    return params


def _round_up(x, m):
    return ((x + m - 1) // m) * m


def prepare_params(params, inputs_dim):
    """One-time prep: transpose weights to (in, out), zero-pad feature dims to
    multiples of 128 (lane-dense), cast weights to bf16. Biases are packed into
    a single f32 row (1, sum(Np_i)) sliced per-layer in the kernel.

    Zero padding is exact: padded input columns are zero, padded weight
    rows/cols are zero, padded bias entries are zero, and relu(0) == 0, so
    padded lanes stay zero through every layer.
    """
    dims = [inputs_dim] + [w.shape[0] for (w, _) in params]
    dims_pad = [_round_up(d, 128) for d in dims]

    w_list = []
    bias_offsets = []
    total_bias = sum(dims_pad[1:])
    b_packed = jnp.zeros((1, total_bias), jnp.float32)
    off = 0
    for i, (w, b) in enumerate(params):
        k, n = dims[i], dims[i + 1]
        kp, np_ = dims_pad[i], dims_pad[i + 1]
        w_t = jnp.zeros((kp, np_), jnp.bfloat16)
        w_t = w_t.at[:k, :n].set(jnp.transpose(w).astype(jnp.bfloat16))
        w_list.append(w_t)
        b_packed = b_packed.at[0, off:off + n].set(b)
        bias_offsets.append(off)
        off += np_
    return w_list, b_packed, dims, dims_pad, tuple(bias_offsets)


def _resident_spec(shape):
    """Constant-index (resident) BlockSpec, single-buffered where supported."""
    idx = lambda i: (0,) * len(shape)
    try:
        return pl.BlockSpec(shape, idx, pipeline_mode=pl.Buffered(1))
    except TypeError:  # older jax without pipeline_mode kwarg
        return pl.BlockSpec(shape, idx)


# ---------------------------------------------------------------------------
# Fused forward pass wrapper
# ---------------------------------------------------------------------------
def dnn_forward_fused(x, w_list, b_packed, dims, dims_pad, bias_offsets,
                      *, tm=512, unpad=True):
    """relu-MLP forward, all layers in one pallas_call, batch tiled on a grid."""
    M, K = x.shape
    assert K == dims[0], f"input dim {K} != expected {dims[0]}"
    num_layers = len(w_list)
    K0p = dims_pad[0]
    NLp = dims_pad[-1]
    layer_dims = tuple(dims_pad[1:])

    # ---- batch tiling ------------------------------------------------------
    M_pad = _round_up(max(M, 8), 8)
    tm = min(tm, M_pad)
    # Ensure >=2 grid tiles when the batch permits so ("parallel",) shards
    # across both TensorCores on v7x (no effect on single-TC v5e/v6e).
    if M_pad // tm < 2 and M_pad >= 16:
        tm = _round_up(pl.cdiv(M_pad, 2), 8)
    M_pad = _round_up(M_pad, tm)
    grid = (M_pad // tm,)

    # ---- input prep: bf16 stream, pad only the deficit ----------------------
    x_b = x.astype(jnp.bfloat16)
    if M_pad != M or K0p != K:
        x_b = jnp.pad(x_b, ((0, M_pad - M), (0, K0p - K)))

    # ---- specs ---------------------------------------------------------------
    in_specs = [pl.BlockSpec((tm, K0p), lambda i: (i, 0)),      # x tile (pipelined)
                _resident_spec(b_packed.shape)]                  # packed biases
    for w_t in w_list:
        in_specs.append(_resident_spec(w_t.shape))               # resident weights

    # ---- VMEM budget / limit -------------------------------------------------
    weight_bytes = sum(int(w.size) * 2 for w in w_list)          # bf16, single buf
    bias_bytes = int(b_packed.size) * 4 * 2                      # (tiny) double buf
    x_tile_bytes = 2 * tm * K0p * 2                              # bf16, double buf
    out_tile_bytes = 2 * tm * NLp * 4                            # f32, double buf
    inter_bytes = tm * max(layer_dims) * (4 + 2)                 # f32 y + bf16 copy
    needed = weight_bytes + bias_bytes + x_tile_bytes + out_tile_bytes + inter_bytes
    # Guard: fully-resident weights must fit the smallest-generation VMEM (v7x 64 MiB).
    assert needed <= 56 << 20, (
        f"resident-weight footprint {needed/2**20:.1f} MiB exceeds the v7x VMEM "
        "budget; split wide layers into a second pallas_call or pipeline them.")
    vmem_limit = max(32 << 20, min(int(needed * 1.5) + (2 << 20), 64 << 20))

    # ---- cost estimate -------------------------------------------------------
    flops = 2 * M_pad * sum(w.shape[0] * w.shape[1] for w in w_list)
    bytes_accessed = (M_pad * K0p * 2 + M_pad * NLp * 4
                      + weight_bytes + int(b_packed.size) * 4)

    out_p = pl.pallas_call(
        functools.partial(_fused_mlp_kernel,
                          layer_dims=layer_dims, bias_offsets=bias_offsets),
        out_shape=jax.ShapeDtypeStruct((M_pad, NLp), jnp.float32),
        grid=grid,
        in_specs=in_specs,
        out_specs=pl.BlockSpec((tm, NLp), lambda i: (i, 0)),
        compiler_params=pltpu.CompilerParams(
            dimension_semantics=("parallel",),
            vmem_limit_bytes=vmem_limit),
        cost_estimate=pl.CostEstimate(
            flops=flops, transcendentals=0, bytes_accessed=bytes_accessed),
    )(x_b, b_packed, *w_list)

    if not unpad:
        return out_p
    # Strip batch / lane padding only if any was added.
    if M_pad != M or NLp != dims[-1]:
        return out_p[:M, :dims[-1]]
    return out_p


# ---------------------------------------------------------------------------
# Pure-JAX reference (f32 everywhere) for correctness checking
# ---------------------------------------------------------------------------
def dnn_forward_ref(x, params):
    out = x
    for (w, b) in params:
        out = jnp.maximum(out @ w.T + b, 0.0)
    return out


if __name__ == "__main__":
    # Small shapes consistent with the module: 2D input (batch, inputs_dim).
    inputs_dim = 32
    hidden_units = [64, 32]

    key = jax.random.PRNGKey(0)
    key, kx1, kx2 = jax.random.split(key, 3)

    params = init_dnn_params(key, inputs_dim, hidden_units, init_std=1e-4)
    w_list, b_packed, dims, dims_pad, bias_offsets = prepare_params(params, inputs_dim)

    # Case 1: tiny batch (single tile).
    x1 = jax.random.normal(kx1, (8, inputs_dim), jnp.float32)
    out1 = dnn_forward_fused(x1, w_list, b_packed, dims, dims_pad, bias_offsets)
    out1 = jax.block_until_ready(out1)
    ref1 = dnn_forward_ref(x1, params)
    assert out1.shape == (8, hidden_units[-1])
    assert jnp.allclose(out1, ref1, atol=5e-3, rtol=5e-3), "mismatch vs reference (8)"

    # Case 2: ragged batch exercising padding + the >=2-tile megacore split.
    x2 = jax.random.normal(kx2, (40, inputs_dim), jnp.float32)
    out2 = dnn_forward_fused(x2, w_list, b_packed, dims, dims_pad, bias_offsets)
    out2 = jax.block_until_ready(out2)
    ref2 = dnn_forward_ref(x2, params)
    assert out2.shape == (40, hidden_units[-1])
    assert jnp.allclose(out2, ref2, atol=5e-3, rtol=5e-3), "mismatch vs reference (40)"

    print("KERNEL_OK")
</pallas_src>

<mosaic_0001>
module attributes {stable_mosaic.version = 11 : i64} {
  func.func @_fused_mlp_kernel(%arg0: i32, %arg1: memref<8x128xbf16, #tpu.memory_space<vmem>>, %arg2: memref<1x256xf32, #tpu.memory_space<vmem>>, %arg3: memref<128x128xbf16, #tpu.memory_space<vmem>>, %arg4: memref<128x128xbf16, #tpu.memory_space<vmem>>, %arg5: memref<8x128xf32, #tpu.memory_space<vmem>>) attributes {dimension_semantics = [#tpu.dimension_semantics<parallel>], iteration_bounds = array<i64: 1>, scalar_prefetch = 0 : i64, scratch_operands = 0 : i64, tpu.core_type = #tpu.core_type<tc>, window_params = [{transform_indices = @transform_0, window_bounds = array<i64: 8, 128>}, {pipeline_mode = #tpu.pipeline_mode<synchronous>, transform_indices = @transform_1, window_bounds = array<i64: 1, 256>}, {pipeline_mode = #tpu.pipeline_mode<synchronous>, transform_indices = @transform_2, window_bounds = array<i64: 128, 128>}, {pipeline_mode = #tpu.pipeline_mode<synchronous>, transform_indices = @transform_3, window_bounds = array<i64: 128, 128>}, {transform_indices = @transform_4, window_bounds = array<i64: 8, 128>}]} {
    %c0 = arith.constant 0 : index
    %c0_0 = arith.constant 0 : index
    %0 = vector.load %arg1[%c0, %c0_0] : memref<8x128xbf16, #tpu.memory_space<vmem>>, vector<8x128xbf16>
    %c0_1 = arith.constant 0 : index
    %c0_2 = arith.constant 0 : index
    %1 = vector.load %arg3[%c0_1, %c0_2] : memref<128x128xbf16, #tpu.memory_space<vmem>>, vector<128x128xbf16>
    %cst = arith.constant dense<0.000000e+00> : vector<8x128xf32>
    %2 = tpu.matmul %0, %1, %cst {dimension_numbers = #tpu.dot_dimension_numbers<[1], [0], [0], [1], [0, 0, 1, 1], [], []>} : vector<8x128xbf16>, vector<128x128xbf16>, vector<8x128xf32> -> vector<8x128xf32>
    %c0_3 = arith.constant 0 : index
    %c0_4 = arith.constant 0 : index
    %3 = vector.load %arg2[%c0_3, %c0_4] : memref<1x256xf32, #tpu.memory_space<vmem>>, vector<1x128xf32>
    %4 = vector.broadcast %3 : vector<1x128xf32> to vector<8x128xf32>
    %5 = arith.addf %2, %4 : vector<8x128xf32>
    %cst_5 = arith.constant 0.000000e+00 : f32
    %6 = vector.broadcast %cst_5 : f32 to vector<8x128xf32>
    %7 = arith.maximumf %5, %6 : vector<8x128xf32>
    %8 = arith.truncf %7 : vector<8x128xf32> to vector<8x128xbf16>
    %c0_6 = arith.constant 0 : index
    %c0_7 = arith.constant 0 : index
    %9 = vector.load %arg4[%c0_6, %c0_7] : memref<128x128xbf16, #tpu.memory_space<vmem>>, vector<128x128xbf16>
    %cst_8 = arith.constant dense<0.000000e+00> : vector<8x128xf32>
    %10 = tpu.matmul %8, %9, %cst_8 {dimension_numbers = #tpu.dot_dimension_numbers<[1], [0], [0], [1], [0, 0, 1, 1], [], []>} : vector<8x128xbf16>, vector<128x128xbf16>, vector<8x128xf32> -> vector<8x128xf32>
    %c0_9 = arith.constant 0 : index
    %c128 = arith.constant 128 : index
    %11 = vector.load %arg2[%c0_9, %c128] : memref<1x256xf32, #tpu.memory_space<vmem>>, vector<1x128xf32>
    %12 = vector.broadcast %11 : vector<1x128xf32> to vector<8x128xf32>
    %13 = arith.addf %10, %12 : vector<8x128xf32>
    %cst_10 = arith.constant 0.000000e+00 : f32
    %14 = vector.broadcast %cst_10 : f32 to vector<8x128xf32>
    %15 = arith.maximumf %13, %14 : vector<8x128xf32>
    %c0_11 = arith.constant 0 : index
    %c0_12 = arith.constant 0 : index
    %16 = vector.load %arg5[%c0_11, %c0_12] : memref<8x128xf32, #tpu.memory_space<vmem>>, vector<8x128xf32>
    tpu.vector_store %arg5[%c0_11, %c0_12], %15 {strides = array<i32>} : memref<8x128xf32, #tpu.memory_space<vmem>>, vector<8x128xf32>,
    return
  }
  func.func @transform_0(%arg0: i32) -> (i32, i32) {
    %c0_i32 = arith.constant 0 : i32
    %c0_i32_0 = arith.constant 0 : i32
    return %arg0, %c0_i32 : i32, i32
  }
  func.func @transform_1(%arg0: i32) -> (i32, i32) {
    %c0_i32 = arith.constant 0 : i32
    %c0_i32_0 = arith.constant 0 : i32
    %c0_i32_1 = arith.constant 0 : i32
    return %c0_i32, %c0_i32_0 : i32, i32
  }
  func.func @transform_2(%arg0: i32) -> (i32, i32) {
    %c0_i32 = arith.constant 0 : i32
    %c0_i32_0 = arith.constant 0 : i32
    %c0_i32_1 = arith.constant 0 : i32
    return %c0_i32, %c0_i32_0 : i32, i32
  }
  func.func @transform_3(%arg0: i32) -> (i32, i32) {
    %c0_i32 = arith.constant 0 : i32
    %c0_i32_0 = arith.constant 0 : i32
    %c0_i32_1 = arith.constant 0 : i32
    return %c0_i32, %c0_i32_0 : i32, i32
  }
  func.func @transform_4(%arg0: i32) -> (i32, i32) {
    %c0_i32 = arith.constant 0 : i32
    %c0_i32_0 = arith.constant 0 : i32
    return %arg0, %c0_i32 : i32, i32
  }
}

</mosaic_0001>

<bundles_post_ra>
// kernel: tpu_custom_call.1
= control target key start
LH: loop header
LB: loop body
LE: loop exit
PB: predicated region body
PF: predicated region fallthrough
CT: control target
= control target key end

     0   :  { %9 = vsyncpa [#allocation3], 0  ;;  %s588_s0 = inlined_call_operand.hbm [shape: bf16[8,128], index: 0, kind: input, shape index: {}]   ;;  %s589_s1 = inlined_call_operand.vmem [shape: f32[1,256], index: 1, kind: input, shape index: {}]   ;;  %s590_s2 = inlined_call_operand.hbm [shape: bf16[128,128], index: 2, kind: input, shape index: {}]   ;;  %s591_s3 = inlined_call_operand.hbm [shape: bf16[128,128], index: 3, kind: input, shape index: {}]   ;;  %s592_s4 = inlined_call_operand.hbm [shape: f32[8,128], index: 4, kind: output, shape index: {}]  }
   0x1   :  { %10 = vsyncpa [#allocation6], 0 }
   0x2   :  { %11 = vsyncpa [#allocation4], 0  ;;  %s495_s15 = smov [#allocation5]   ;;  %s401_s19 = scalar_lea.hbm %s590_s2, 1024 }
   0x3   :  { %s29_s16 = sshll.u32 %s495_s15, 4  ;;  %p402_p0 = scmp.ne.s32.totalorder %s590_s2, %s401_s19  ;;  %s30_s16 = int_to_ptr.vmem [resolvable:$true] %s29_s16 }
   0x4   :  { %p405_p1 = scmp.lt.u32.totalorder %s401_s19, %s590_s2 }
   0x6   :  { %p407_p2 = pnand %p405_p1, %p402_p0 }
   0x8   :  { %410 = shalt.err (!%p407_p2)
}
   0x9   :  { %s411_s24 = scalar_lea.vmem %s30_s16, 1024  ;;  %p416_p4 = scmp.lt.s32.totalorder %s30_s16, %s30_s16 }
   0xa   :  { %p412_p3 = scmp.ne.s32.totalorder %s30_s16, %s411_s24  ;;  %p417_p5 = scmp.lt.s32.totalorder %s411_s24, %s411_s24 }
   0xc   :  { %p418_p6 = por %p417_p5, %p416_p4 }
   0xe   :  { %p419_p7 = pnand %p418_p6, %p412_p3 }
  0x10   :  { %422 = shalt.err (!%p419_p7)
}
  0x11   :  { %s496_s25 = smov 64   ;;  %s497_s26 = smov 4  }
  0x12   :  { %35 = dma.hbm_to_vmem [thread:$0]  %s590_s2, 1024, %s30_s16, [#allocation6], %s496_s25, %s496_s25, %s497_s26  }
  0x13   :  { %s498_s29 = smov [#allocation2]   ;;  %s499_s5 = smov [#allocation7]  }
  0x14   :  { %s18_s30 = sshll.u32 %s498_s29, 4  ;;  %s41_s6 = sshll.u32 %s499_s5, 4  ;;  %s19_s30 = int_to_ptr.vmem [resolvable:$true] %s18_s30  ;;  %s42_s6 = int_to_ptr.vmem [resolvable:$true] %s41_s6 }
  0x15   :  { %s423_s9 = scalar_lea.hbm %s588_s0, 64 }
  0x16   :  { %p424_p8 = scmp.ne.s32.totalorder %s588_s0, %s423_s9  ;;  %p427_p9 = scmp.lt.u32.totalorder %s423_s9, %s588_s0 }
  0x18   :  { %p429_p10 = pnand %p427_p9, %p424_p8 }
  0x1a   :  { %432 = shalt.err (!%p429_p10)
}
  0x1b   :  { %s433_s2 = scalar_lea.vmem %s19_s30, 64  ;;  %p438_p12 = scmp.lt.s32.totalorder %s19_s30, %s19_s30 }
  0x1c   :  { %p434_p11 = scmp.ne.s32.totalorder %s19_s30, %s433_s2  ;;  %p439_p13 = scmp.lt.s32.totalorder %s433_s2, %s433_s2 }
  0x1e   :  { %p440_p0 = por %p439_p13, %p438_p12 }
  0x20   :  { %p441_p1 = pnand %p440_p0, %p434_p11 }
  0x22   :  { %444 = shalt.err (!%p441_p1)
}
  0x23   :  { %21 = dma.hbm_to_vmem [thread:$0]  %s588_s0, 64, %s19_s30, [#allocation3]  }
  0x24   :  { %s445_s18 = scalar_lea.hbm %s591_s3, 1024 }
  0x25   :  { %p446_p2 = scmp.ne.s32.totalorder %s591_s3, %s445_s18  ;;  %p449_p3 = scmp.lt.u32.totalorder %s445_s18, %s591_s3 }
  0x27   :  { %p451_p4 = pnand %p449_p3, %p446_p2 }
  0x29   :  { %454 = shalt.err (!%p451_p4)
}
  0x2a   :  { %s455_s23 = scalar_lea.vmem %s42_s6, 1024  ;;  %p460_p6 = scmp.lt.s32.totalorder %s42_s6, %s42_s6 }
  0x2b   :  { %p456_p5 = scmp.ne.s32.totalorder %s42_s6, %s455_s23  ;;  %p461_p7 = scmp.lt.s32.totalorder %s455_s23, %s455_s23 }
  0x2d   :  { %p462_p8 = por %p461_p7, %p460_p6 }
  0x2f   :  { %p463_p9 = pnand %p462_p8, %p456_p5 }
  0x31   :  { %466 = shalt.err (!%p463_p9)
}
  0x32   :  { %47 = dma.hbm_to_vmem [thread:$0]  %s591_s3, 1024, %s42_s6, [#allocation6], %s496_s25, %s496_s25, %s497_s26  }
  0x33   :  { %489 = dma.done.wait [#allocation3], 64  }
  0x34   :  { %490 = vsyncadd [#allocation3], 4294967232 }
  0x35   :  { %491 = dma.done.wait [#allocation6], 2048  }
  0x36   :  { %492 = vsyncadd [#allocation6], 4294965248  ;;  %v500_v0 = vmov 0.0   ;;  %vm501_vm0 = vmmov 0   ;;  %v385_v1 = vld [vmem:[#allocation5] sm:$0xff]   ;;  %v386_v2 = vld [vmem:[#allocation5 + $0x8] sm:$0xff]  }
  0x37   :  { %337 = vmatprep.subr.bf16.mxu0 %v500_v0  ;;  %353 = vmatprep.mubr.msk.bf16.mxu0 %vm501_vm0, %v500_v0  ;;  %v387_v3 = vld [vmem:[#allocation5 + $0x10] sm:$0xff]   ;;  %v393_v4 = vld [vmem:[#allocation7] sm:$0xff]   ;;  %v388_v5 = vld [vmem:[#allocation5 + $0x18] sm:$0xff]   ;;  %s502_s28 = smov [#allocation8]  }
  0x38   :  { %357 = vmatprep.subr.bf16.mxu1 %v500_v0  ;;  %373 = vmatprep.mubr.msk.bf16.mxu1 %vm501_vm0, %v500_v0  ;;  %v394_v6 = vld [vmem:[#allocation7 + $0x8] sm:$0xff]   ;;  %v389_v7 = vld [vmem:[#allocation5 + $0x20] sm:$0xff]   ;;  %v395_v8 = vld [vmem:[#allocation7 + $0x10] sm:$0xff]   ;;  %s291_s29 = sshll.u32 %s502_s28, 4  ;;  %s292_s29 = int_to_ptr.vmem [resolvable:$true] %s291_s29 }
  0x39   :  { %338 = vmatpush3.bf16.msra.mxu0 %v385_v1  ;;  %358 = vmatpush3.bf16.msra.mxu1 %v393_v4  ;;  %v390_v9 = vld [vmem:[#allocation5 + $0x28] sm:$0xff]   ;;  %v396_v10 = vld [vmem:[#allocation7 + $0x18] sm:$0xff]   ;;  %v391_v11 = vld [vmem:[#allocation5 + $0x30] sm:$0xff]   ;;  %s467_s30 = scalar_lea.vmem %s292_s29, 128  ;;  %p472_p11 = scmp.lt.s32.totalorder %s292_s29, %s292_s29 }
  0x3a   :  { %339 = vmatprep.subr.bf16.mxu0 %v500_v0  ;;  %359 = vmatprep.subr.bf16.mxu1 %v500_v0  ;;  %v397_v12 = vld [vmem:[#allocation7 + $0x20] sm:$0xff]   ;;  %v392_v13 = vld [vmem:[#allocation5 + $0x38] sm:$0xff]   ;;  %v398_v14 = vld [vmem:[#allocation7 + $0x28] sm:$0xff]   ;;  %p468_p10 = scmp.ne.s32.totalorder %s292_s29, %s467_s30  ;;  %p473_p12 = scmp.lt.s32.totalorder %s467_s30, %s467_s30 }
  0x3b   :  { %v58_v15 = vld [vmem:[#allocation2] sm:$0xf]  ;;  %v399_v16 = vld [vmem:[#allocation7 + $0x30] sm:$0xff]  }
  0x3c   :  { %v400_v17 = vld [vmem:[#allocation7 + $0x38] sm:$0xff]   ;;  %p474_p13 = por %p473_p12, %p472_p11 }
  0x3d   :  { %340 = vmatpush3.bf16.msra.mxu0 %v386_v2  ;;  %360 = vmatpush3.bf16.msra.mxu1 %v394_v6  ;;  %v301_v18 = vld [vmem:[%s589_s1] ss:$0 sm:$0xff]  ;;  %v310_v26 = vld [vmem:[%s589_s1 + $0x1] ss:$0 sm:$0xff] }
  0x3e   :  { %341 = vmatprep.subr.bf16.mxu0 %v500_v0  ;;  %361 = vmatprep.subr.bf16.mxu1 %v500_v0  ;;  %p475_p0 = pnand %p474_p13, %p468_p10 }
  0x41   :  { %342 = vmatpush3.bf16.msra.mxu0 %v387_v3  ;;  %362 = vmatpush3.bf16.msra.mxu1 %v395_v8 }
  0x42   :  { %343 = vmatprep.subr.bf16.mxu0 %v500_v0  ;;  %363 = vmatprep.subr.bf16.mxu1 %v500_v0 }
  0x45   :  { %344 = vmatpush3.bf16.msra.mxu0 %v388_v5  ;;  %364 = vmatpush3.bf16.msra.mxu1 %v396_v10 }
  0x46   :  { %345 = vmatprep.subr.bf16.mxu0 %v500_v0  ;;  %365 = vmatprep.subr.bf16.mxu1 %v500_v0 }
  0x49   :  { %346 = vmatpush3.bf16.msra.mxu0 %v389_v7  ;;  %366 = vmatpush3.bf16.msra.mxu1 %v397_v12 }
  0x4a   :  { %347 = vmatprep.subr.bf16.mxu0 %v500_v0  ;;  %367 = vmatprep.subr.bf16.mxu1 %v500_v0 }
  0x4d   :  { %348 = vmatpush3.bf16.msra.mxu0 %v390_v9  ;;  %368 = vmatpush3.bf16.msra.mxu1 %v398_v14 }
  0x4e   :  { %349 = vmatprep.subr.bf16.mxu0 %v500_v0  ;;  %369 = vmatprep.subr.bf16.mxu1 %v500_v0 }
  0x51   :  { %350 = vmatpush3.bf16.msra.mxu0 %v391_v11  ;;  %370 = vmatpush3.bf16.msra.mxu1 %v399_v16 }
  0x52   :  { %351 = vmatprep.subr.bf16.mxu0 %v500_v0  ;;  %371 = vmatprep.subr.bf16.mxu1 %v500_v0 }
  0x55   :  { %352 = vmatpush3.bf16.msra.mxu0 %v392_v13  ;;  %372 = vmatpush3.bf16.msra.mxu1 %v400_v17 }
  0x58   :  { %354 = vmatmul.mubr.bf16.vlgmr.msra.gmra.mrb[0].mxu0 %v58_v15 }
 0x12b   :  { %v164_v19 = vpop.f32.mrb[0].mxu0 }
 0x12c   :  { %v165_v20 = vadd.f32 %v301_v18, %v164_v19  ;;  %v355_v21 = vpop.f32.mrb[1].mxu0 }
 0x12d   :  { %v167_v22 = vpop.f32.mrb[2].mxu0 }
 0x12e   :  { %v170_v23 = vmax.f32 %v165_v20, 0.0  ;;  %v356_v24 = vpop.f32.mrb[3].mxu0 }
 0x130   :  { %v171_v25 = vpack.c.bf16 %v170_v23, %v170_v23 }
 0x132   :  { %374 = vmatmul.mubr.bf16.vlgmr.msra.gmra.mrb[0].mxu1 %v171_v25 }
 0x205   :  { %v277_v27 = vpop.f32.mrb[0].mxu1 }
 0x206   :  { %v278_v28 = vadd.f32 %v310_v26, %v277_v27  ;;  %v375_v29 = vpop.f32.mrb[1].mxu1 }
 0x207   :  { %v280_v30 = vpop.f32.mrb[2].mxu1 }
 0x208   :  { %v283_v31 = vmax.f32 %v278_v28, 0.0  ;;  %v376_v32 = vpop.f32.mrb[3].mxu1 }
 0x20a   :  { %284 = vst [vmem:[#allocation8] sm:$0xff] %v283_v31 }
 0x20b   :  { %478 = shalt.err (!%p475_p0)
}
 0x20c   :  { %s479_s1 = scalar_lea.hbm %s592_s4, 128 }
 0x20d   :  { %p480_p1 = scmp.ne.s32.totalorder %s592_s4, %s479_s1  ;;  %p483_p2 = scmp.lt.u32.totalorder %s479_s1, %s592_s4 }
 0x20f   :  { %p485_p3 = pnand %p483_p2, %p480_p1 }
 0x211   :  { %488 = shalt.err (!%p485_p3)
}
 0x212   :  { %294 = dma.vmem_to_hbm [thread:$0]  %s292_s29, 128, %s592_s4, [#allocation4]  }
 0x213   :  { %493 = dma.done.wait [#allocation4], 128  }
 0x214   :  { %494 = vsyncadd [#allocation4], 4294967168 }
 0x215   :  { %298 = vsyncpa [#allocation3], 1 }
 0x216   :  { %299 = vsyncpa [#allocation6], 1 }
 0x217   :  { %300 = vsyncpa [#allocation4], 1 }

</bundles_post_ra>
